<compile_context>
chip_gen: v7x
topology: tpu7x:2x2x1
jax: 0.10.0
libtpu: 0.0.40
codegen_flags: <defaults>
</compile_context>

<pallas_src>
import functools

import jax
import jax.numpy as jnp
import numpy as np
from jax.experimental import pallas as pl
from jax.experimental.pallas import tpu as pltpu


def _round_up(x: int, m: int) -> int:
    return ((x + m - 1) // m) * m


def _stroke_init_kernel(x_ref, o_ref, *, c: int):
    # x_ref: (TILE_N, c) input stroke params
    # o_ref: (TILE_N, c + 4) padded + shuffled stroke params
    x = x_ref[...]
    # Direct sub-slice stores (static slices; no concatenate temp).
    o_ref[:, :c] = x                                   # original c columns
    o_ref[:, c:c + 3] = x[:, c - 3:c]                  # copy of original last 3 columns
    o_ref[:, c + 3:c + 4] = jnp.zeros((x.shape[0], 1), dtype=x.dtype)  # final zero column


def _reference(stroke: jax.Array) -> jax.Array:
    """Pure-JAX equivalent of the Stroke.__init__ transform (used for tiny N)."""
    pad_width = [(0, 0)] * (stroke.ndim - 1) + [(0, 4)]
    p = jnp.pad(stroke, pad_width)
    p = p.at[..., -4:-1].set(p[..., -7:-4])
    p = p.at[..., -1].set(0)
    return p


def make_stroke_param(
    stroke: jax.Array,
    *,
    tile_n: int = 512,
    min_rows_for_pallas: int = 4096,
    force_pallas: bool = False,
) -> jax.Array:
    """Builds the Stroke parameter (the work done in Stroke.__init__)."""
    orig_shape = stroke.shape
    C = orig_shape[-1]
    assert C >= 3, "stroke last dim must be >= 3 (needs stroke[..., -7:-4] of padded)"

    # Flatten leading dims so the kernel sees a 2D (N, C) table.
    x2d = stroke.reshape(-1, C)
    N = x2d.shape[0]

    # Tiny tables: custom-call launch overhead >> the ~KBs of data moved.
    if not force_pallas and N < min_rows_for_pallas:
        return _reference(stroke)

    # Pallas path: tile over N, auto-pipelined, megacore-parallel.
    # Tile is tiny for typical C (C=9 -> ~50 KiB double-buffered at TILE_N=512),
    # comfortably under the scoped VMEM limit on all of v5e/v6e/v7x.
    tile_n = min(tile_n, _round_up(N, 8))
    n_pad = _round_up(N, tile_n)
    if n_pad != N:
        x2d = jnp.pad(x2d, ((0, n_pad - N), (0, 0)))

    kernel = functools.partial(_stroke_init_kernel, c=C)
    out2d = pl.pallas_call(
        kernel,
        out_shape=jax.ShapeDtypeStruct((n_pad, C + 4), stroke.dtype),
        grid=(pl.cdiv(n_pad, tile_n),),
        in_specs=[pl.BlockSpec((tile_n, C), lambda i: (i, 0))],
        out_specs=pl.BlockSpec((tile_n, C + 4), lambda i: (i, 0)),
        compiler_params=pltpu.CompilerParams(
            dimension_semantics=("parallel",),  # v7x: shard N tiles across 2 TCs
        ),
    )(x2d)

    if n_pad != N:
        out2d = out2d[:N]
    return out2d.reshape(orig_shape[:-1] + (C + 4,))


class Stroke:
    """JAX/Pallas equivalent of the PyTorch Stroke module."""

    def __init__(self, stroke: jax.Array, **kwargs):
        # Parameter is materialized once (Pallas kernel for large tables).
        self.stroke = make_stroke_param(stroke, **kwargs)

    def forward(self) -> jax.Array:
        return self.stroke

    __call__ = forward


if __name__ == "__main__":
    key = jax.random.PRNGKey(0)
    k_small, k_large = jax.random.split(key)

    # Case 1: the shipped tiny workload (16 strokes, 9 params each) through the
    # module; dispatches to the fused pure-JAX path (launch overhead dominates).
    stroke_small = jax.random.normal(k_small, (16, 9), dtype=jnp.float32)
    module = Stroke(stroke_small)
    out_small = jax.block_until_ready(module())
    ref_small = jax.block_until_ready(_reference(stroke_small))
    np.testing.assert_allclose(np.asarray(out_small), np.asarray(ref_small), rtol=0, atol=0)

    # Case 2: a larger, ragged table forced through the Pallas kernel
    # (exercises tiling over N, tail padding, and direct sub-slice stores).
    stroke_large = jax.random.normal(k_large, (1000, 9), dtype=jnp.float32)
    module_pl = Stroke(stroke_large, force_pallas=True, tile_n=256)
    out_large = jax.block_until_ready(module_pl())
    ref_large = jax.block_until_ready(_reference(stroke_large))
    np.testing.assert_allclose(np.asarray(out_large), np.asarray(ref_large), rtol=0, atol=0)

    print("KERNEL_OK")
</pallas_src>

<mosaic_0001>
module attributes {stable_mosaic.version = 11 : i64} {
  func.func @_stroke_init_kernel(%arg0: i32, %arg1: memref<256x9xf32, #tpu.memory_space<vmem>>, %arg2: memref<256x13xf32, #tpu.memory_space<vmem>>) attributes {dimension_semantics = [#tpu.dimension_semantics<parallel>], iteration_bounds = array<i64: 4>, scalar_prefetch = 0 : i64, scratch_operands = 0 : i64, tpu.core_type = #tpu.core_type<tc>, window_params = [{transform_indices = @transform_0, window_bounds = array<i64: 256, 9>}, {transform_indices = @transform_1, window_bounds = array<i64: 256, 13>}]} {
    %c0 = arith.constant 0 : index
    %c0_0 = arith.constant 0 : index
    %0 = vector.load %arg1[%c0, %c0_0] : memref<256x9xf32, #tpu.memory_space<vmem>>, vector<256x9xf32>
    %c0_1 = arith.constant 0 : index
    %c0_2 = arith.constant 0 : index
    %1 = vector.load %arg2[%c0_1, %c0_2] : memref<256x13xf32, #tpu.memory_space<vmem>>, vector<256x9xf32>
    tpu.vector_store %arg2[%c0_1, %c0_2], %0 {strides = array<i32>} : memref<256x13xf32, #tpu.memory_space<vmem>>, vector<256x9xf32>,
    %2 = vector.extract_strided_slice %0 {offsets = [0, 6], sizes = [256, 3], strides = [1, 1]} : vector<256x9xf32> to vector<256x3xf32>
    %c0_3 = arith.constant 0 : index
    %c9 = arith.constant 9 : index
    %3 = vector.load %arg2[%c0_3, %c9] : memref<256x13xf32, #tpu.memory_space<vmem>>, vector<256x3xf32>
    tpu.vector_store %arg2[%c0_3, %c9], %2 {strides = array<i32>} : memref<256x13xf32, #tpu.memory_space<vmem>>, vector<256x3xf32>,
    %cst = arith.constant 0.000000e+00 : f32
    %4 = vector.broadcast %cst : f32 to vector<256x1xf32>
    %c0_4 = arith.constant 0 : index
    %c12 = arith.constant 12 : index
    %5 = vector.load %arg2[%c0_4, %c12] : memref<256x13xf32, #tpu.memory_space<vmem>>, vector<256x1xf32>
    tpu.vector_store %arg2[%c0_4, %c12], %4 {strides = array<i32>} : memref<256x13xf32, #tpu.memory_space<vmem>>, vector<256x1xf32>,
    return
  }
  func.func @transform_0(%arg0: i32) -> (i32, i32) {
    %c0_i32 = arith.constant 0 : i32
    %c0_i32_0 = arith.constant 0 : i32
    return %arg0, %c0_i32 : i32, i32
  }
  func.func @transform_1(%arg0: i32) -> (i32, i32) {
    %c0_i32 = arith.constant 0 : i32
    %c0_i32_0 = arith.constant 0 : i32
    return %arg0, %c0_i32 : i32, i32
  }
}

</mosaic_0001>

<bundles_post_ra>
// kernel: tpu_custom_call.1
= control target key start
LH: loop header
LB: loop body
LE: loop exit
PB: predicated region body
PF: predicated region fallthrough
CT: control target
= control target key end

     0   :  { %s476_s6 = smov 0   ;;  %s785_s0 = inlined_call_operand.vmem [shape: f32[1024,9], index: 0, kind: input, shape index: {}]   ;;  %s786_s1 = inlined_call_operand.vmem [shape: f32[1024,13], index: 1, kind: output, shape index: {}]  }
   0x1 LB: > { %s435_s7 = sadd.s32 4294967295, %s462_s6   ;;  %p439_p0 = scmp.ge.s32.totalorder %s462_s6, 1  ;;  %s462_s6 = sphi %s476_s6, %s11_s6  }
   0x2   : > { %p88_p1 = scmp.lt.s32.totalorder %s462_s6, 5 }
   0x4   : > { %p89_p2 = pnand %p439_p0, %p88_p1 }
   0x5   : > { %s440_s8 = sshll.u32 (!%p89_p2), %s435_s7, 5  ;;  %vm152_vm0 = vcmask (!%p89_p2), 72704   ;;  %s464_s16 = smov (!%p89_p2), 3   ;;  %vm313_vm1 = vcmask (!%p89_p2), 97352   ;;  %vm346_vm2 = vcmask (!%p89_p2), 105568   ;;  %v465_v34 = vmov (!%p89_p2), 0.0  }
   0x6   : > { %92 = sbr.rel (%p89_p2) target bundleno = 198 (0xc6), region = 24  ;;  %p109_p3 = scmp.lt.s32.totalorder (!%p89_p2), %s440_s8, 127 }
   0xd   : > { %s788_s8 = smov (!%p109_p3, %s440_s8), 127 }
   0xe   : > { %s441_s9 = sshll.u32 %s788_s8, 3 }
   0xf   : > { %s487_s12 = scalar_lea.vmem %s785_s0, %s441_s9  ;;  %s492_s15 = scalar_lea.vmem %s786_s1, %s441_s9 }
  0x10   : > { %v122_v0 = vld [vmem:[%s487_s12 + $0x10] sm:$0xff]  ;;  %v120_v1 = vld [vmem:[%s487_s12] sm:$0xff]  ;;  %v123_v2 = vld [vmem:[%s487_s12 + $0x18] sm:$0xff] }
  0x11   : > { %221 = vrot.lane.b32.xlu1 %v122_v0, %s464_s16  ;;  %155 = vst.msk [vmem:[%s492_s15 + $0x10] sm:$0xff] %vm152_vm0, %v122_v0  ;;  %217 = vrot.lane.b32.xlu0 %v120_v1, %s464_s16  ;;  %153 = vst.msk [vmem:[%s492_s15] sm:$0xff] %vm152_vm0, %v120_v1 }
  0x12   : > { %156 = vst.msk [vmem:[%s492_s15 + $0x18] sm:$0xff] %vm152_vm0, %v123_v2  ;;  %v121_v3 = vld [vmem:[%s487_s12 + $0x8] sm:$0xff]  ;;  %v124_v5 = vld [vmem:[%s487_s12 + $0x20] sm:$0xff]  ;;  %v127_v6 = vld [vmem:[%s487_s12 + $0x38] sm:$0xff] }
  0x13   : > { %v125_v4 = vld [vmem:[%s487_s12 + $0x28] sm:$0xff]  ;;  %154 = vst.msk [vmem:[%s492_s15 + $0x8] sm:$0xff] %vm152_vm0, %v121_v3  ;;  %v126_v7 = vld [vmem:[%s487_s12 + $0x30] sm:$0xff]  ;;  %157 = vst.msk [vmem:[%s492_s15 + $0x20] sm:$0xff] %vm152_vm0, %v124_v5 }
  0x14   : > { %158 = vst.msk [vmem:[%s492_s15 + $0x28] sm:$0xff] %vm152_vm0, %v125_v4  ;;  %160 = vst.msk [vmem:[%s492_s15 + $0x38] sm:$0xff] %vm152_vm0, %v127_v6  ;;  %v129_v8 = vld [vmem:[%s487_s12 + $0x48] sm:$0xff]  ;;  %v128_v9 = vld [vmem:[%s487_s12 + $0x40] sm:$0xff] }
  0x15   : > { %159 = vst.msk [vmem:[%s492_s15 + $0x30] sm:$0xff] %vm152_vm0, %v126_v7  ;;  %v131_v10 = vld [vmem:[%s487_s12 + $0x58] sm:$0xff]  ;;  %162 = vst.msk [vmem:[%s492_s15 + $0x48] sm:$0xff] %vm152_vm0, %v129_v8  ;;  %v130_v11 = vld [vmem:[%s487_s12 + $0x50] sm:$0xff] }
  0x16   : > { %161 = vst.msk [vmem:[%s492_s15 + $0x40] sm:$0xff] %vm152_vm0, %v128_v9  ;;  %164 = vst.msk [vmem:[%s492_s15 + $0x58] sm:$0xff] %vm152_vm0, %v131_v10  ;;  %v133_v12 = vld [vmem:[%s487_s12 + $0x68] sm:$0xff]  ;;  %v132_v13 = vld [vmem:[%s487_s12 + $0x60] sm:$0xff] }
  0x17   : > { %223 = vrot.lane.b32.xlu1 %v123_v2, %s464_s16  ;;  %219 = vrot.lane.b32.xlu0 %v121_v3, %s464_s16  ;;  %163 = vst.msk [vmem:[%s492_s15 + $0x50] sm:$0xff] %vm152_vm0, %v130_v11  ;;  %166 = vst.msk [vmem:[%s492_s15 + $0x68] sm:$0xff] %vm152_vm0, %v133_v12 }
  0x18   : > { %165 = vst.msk [vmem:[%s492_s15 + $0x60] sm:$0xff] %vm152_vm0, %v132_v13  ;;  %v135_v14 = vld [vmem:[%s487_s12 + $0x78] sm:$0xff]  ;;  %v134_v15 = vld [vmem:[%s487_s12 + $0x70] sm:$0xff]  ;;  %v137_v16 = vld [vmem:[%s487_s12 + $0x88] sm:$0xff] }
  0x19   : > { %168 = vst.msk [vmem:[%s492_s15 + $0x78] sm:$0xff] %vm152_vm0, %v135_v14  ;;  %167 = vst.msk [vmem:[%s492_s15 + $0x70] sm:$0xff] %vm152_vm0, %v134_v15  ;;  %v136_v17 = vld [vmem:[%s487_s12 + $0x80] sm:$0xff]  ;;  %v139_v18 = vld [vmem:[%s487_s12 + $0x98] sm:$0xff] }
  0x1a   : > { %170 = vst.msk [vmem:[%s492_s15 + $0x88] sm:$0xff] %vm152_vm0, %v137_v16  ;;  %169 = vst.msk [vmem:[%s492_s15 + $0x80] sm:$0xff] %vm152_vm0, %v136_v17  ;;  %v138_v19 = vld [vmem:[%s487_s12 + $0x90] sm:$0xff]  ;;  %v141_v20 = vld [vmem:[%s487_s12 + $0xa8] sm:$0xff] }
  0x1b   : > { %172 = vst.msk [vmem:[%s492_s15 + $0x98] sm:$0xff] %vm152_vm0, %v139_v18  ;;  %v140_v21 = vld [vmem:[%s487_s12 + $0xa0] sm:$0xff]  ;;  %171 = vst.msk [vmem:[%s492_s15 + $0x90] sm:$0xff] %vm152_vm0, %v138_v19  ;;  %v143_v22 = vld [vmem:[%s487_s12 + $0xb8] sm:$0xff] }
  0x1c   : > { %174 = vst.msk [vmem:[%s492_s15 + $0xa8] sm:$0xff] %vm152_vm0, %v141_v20  ;;  %173 = vst.msk [vmem:[%s492_s15 + $0xa0] sm:$0xff] %vm152_vm0, %v140_v21  ;;  %v142_v23 = vld [vmem:[%s487_s12 + $0xb0] sm:$0xff]  ;;  %v145_v24 = vld [vmem:[%s487_s12 + $0xc8] sm:$0xff] }
  0x1d   : > { %227 = vrot.lane.b32.xlu1 %v125_v4, %s464_s16  ;;  %225 = vrot.lane.b32.xlu0 %v124_v5, %s464_s16  ;;  %176 = vst.msk [vmem:[%s492_s15 + $0xb8] sm:$0xff] %vm152_vm0, %v143_v22  ;;  %175 = vst.msk [vmem:[%s492_s15 + $0xb0] sm:$0xff] %vm152_vm0, %v142_v23 }
  0x1e   : > { %178 = vst.msk [vmem:[%s492_s15 + $0xc8] sm:$0xff] %vm152_vm0, %v145_v24  ;;  %v144_v25 = vld [vmem:[%s487_s12 + $0xc0] sm:$0xff]  ;;  %v147_v26 = vld [vmem:[%s487_s12 + $0xd8] sm:$0xff]  ;;  %v146_v27 = vld [vmem:[%s487_s12 + $0xd0] sm:$0xff] }
  0x1f   : > { %177 = vst.msk [vmem:[%s492_s15 + $0xc0] sm:$0xff] %vm152_vm0, %v144_v25  ;;  %180 = vst.msk [vmem:[%s492_s15 + $0xd8] sm:$0xff] %vm152_vm0, %v147_v26  ;;  %v149_v28 = vld [vmem:[%s487_s12 + $0xe8] sm:$0xff]  ;;  %v148_v29 = vld [vmem:[%s487_s12 + $0xe0] sm:$0xff] }
  0x20   : > { %179 = vst.msk [vmem:[%s492_s15 + $0xd0] sm:$0xff] %vm152_vm0, %v146_v27  ;;  %182 = vst.msk [vmem:[%s492_s15 + $0xe8] sm:$0xff] %vm152_vm0, %v149_v28  ;;  %v151_v30 = vld [vmem:[%s487_s12 + $0xf8] sm:$0xff]  ;;  %v150_v31 = vld [vmem:[%s487_s12 + $0xf0] sm:$0xff] }
  0x21   : > { %181 = vst.msk [vmem:[%s492_s15 + $0xe0] sm:$0xff] %vm152_vm0, %v148_v29  ;;  %184 = vst.msk [vmem:[%s492_s15 + $0xf8] sm:$0xff] %vm152_vm0, %v151_v30  ;;  %231 = vrot.lane.b32.xlu1 %v127_v6, %s464_s16  ;;  %229 = vrot.lane.b32.xlu0 %v126_v7, %s464_s16 }
  0x22   : > { %183 = vst.msk [vmem:[%s492_s15 + $0xf0] sm:$0xff] %vm152_vm0, %v150_v31 }
  0x25   : > { %235 = vrot.lane.b32.xlu1 %v129_v8, %s464_s16  ;;  %233 = vrot.lane.b32.xlu0 %v128_v9, %s464_s16 }
  0x29   : > { %239 = vrot.lane.b32.xlu1 %v131_v10, %s464_s16  ;;  %237 = vrot.lane.b32.xlu0 %v130_v11, %s464_s16 }
  0x2d   : > { %243 = vrot.lane.b32.xlu1 %v133_v12, %s464_s16  ;;  %241 = vrot.lane.b32.xlu0 %v132_v13, %s464_s16 }
  0x31   : > { %247 = vrot.lane.b32.xlu1 %v135_v14, %s464_s16  ;;  %245 = vrot.lane.b32.xlu0 %v134_v15, %s464_s16 }
  0x35   : > { %251 = vrot.lane.b32.xlu1 %v137_v16, %s464_s16  ;;  %249 = vrot.lane.b32.xlu0 %v136_v17, %s464_s16 }
  0x39   : > { %255 = vrot.lane.b32.xlu1 %v139_v18, %s464_s16  ;;  %253 = vrot.lane.b32.xlu0 %v138_v19, %s464_s16 }
  0x3d   : > { %259 = vrot.lane.b32.xlu1 %v141_v20, %s464_s16  ;;  %257 = vrot.lane.b32.xlu0 %v140_v21, %s464_s16 }
  0x41   : > { %263 = vrot.lane.b32.xlu1 %v143_v22, %s464_s16  ;;  %261 = vrot.lane.b32.xlu0 %v142_v23, %s464_s16 }
  0x45   : > { %267 = vrot.lane.b32.xlu1 %v145_v24, %s464_s16  ;;  %265 = vrot.lane.b32.xlu0 %v144_v25, %s464_s16 }
  0x49   : > { %271 = vrot.lane.b32.xlu1 %v147_v26, %s464_s16  ;;  %269 = vrot.lane.b32.xlu0 %v146_v27, %s464_s16 }
  0x4d   : > { %275 = vrot.lane.b32.xlu1 %v149_v28, %s464_s16  ;;  %273 = vrot.lane.b32.xlu0 %v148_v29, %s464_s16 }
  0x51   : > { %279 = vrot.lane.b32.xlu1 %v151_v30, %s464_s16  ;;  %277 = vrot.lane.b32.xlu0 %v150_v31, %s464_s16 }
  0x83   : > { %v222_v32 = vpop.permute.xlu1 %221  ;;  %v218_v33 = vpop.permute.xlu0 %217 }
  0x84   : > { %316 = vst.msk [vmem:[%s492_s15 + $0x10] sm:$0xff] %vm313_vm1, %v222_v32  ;;  %314 = vst.msk [vmem:[%s492_s15] sm:$0xff] %vm313_vm1, %v218_v33 }
  0x85   : > { %349 = vst.msk [vmem:[%s492_s15 + $0x10] sm:$0xff] %vm346_vm2, %v465_v34  ;;  %347 = vst.msk [vmem:[%s492_s15] sm:$0xff] %vm346_vm2, %v465_v34 }
  0x89   : > { %v224_v35 = vpop.permute.xlu1 %223  ;;  %v220_v36 = vpop.permute.xlu0 %219 }
  0x8a   : > { %317 = vst.msk [vmem:[%s492_s15 + $0x18] sm:$0xff] %vm313_vm1, %v224_v35  ;;  %315 = vst.msk [vmem:[%s492_s15 + $0x8] sm:$0xff] %vm313_vm1, %v220_v36 }
  0x8b   : > { %350 = vst.msk [vmem:[%s492_s15 + $0x18] sm:$0xff] %vm346_vm2, %v465_v34  ;;  %348 = vst.msk [vmem:[%s492_s15 + $0x8] sm:$0xff] %vm346_vm2, %v465_v34 }
  0x8f   : > { %v228_v37 = vpop.permute.xlu1 %227  ;;  %v226_v38 = vpop.permute.xlu0 %225 }
  0x90   : > { %319 = vst.msk [vmem:[%s492_s15 + $0x28] sm:$0xff] %vm313_vm1, %v228_v37  ;;  %318 = vst.msk [vmem:[%s492_s15 + $0x20] sm:$0xff] %vm313_vm1, %v226_v38 }
  0x91   : > { %352 = vst.msk [vmem:[%s492_s15 + $0x28] sm:$0xff] %vm346_vm2, %v465_v34  ;;  %351 = vst.msk [vmem:[%s492_s15 + $0x20] sm:$0xff] %vm346_vm2, %v465_v34 }
  0x93   : > { %v232_v39 = vpop.permute.xlu1 %231  ;;  %v230_v40 = vpop.permute.xlu0 %229 }
  0x94   : > { %321 = vst.msk [vmem:[%s492_s15 + $0x38] sm:$0xff] %vm313_vm1, %v232_v39  ;;  %320 = vst.msk [vmem:[%s492_s15 + $0x30] sm:$0xff] %vm313_vm1, %v230_v40 }
  0x95   : > { %354 = vst.msk [vmem:[%s492_s15 + $0x38] sm:$0xff] %vm346_vm2, %v465_v34  ;;  %353 = vst.msk [vmem:[%s492_s15 + $0x30] sm:$0xff] %vm346_vm2, %v465_v34 }
  0x97   : > { %v236_v41 = vpop.permute.xlu1 %235  ;;  %v234_v42 = vpop.permute.xlu0 %233 }
  0x98   : > { %323 = vst.msk [vmem:[%s492_s15 + $0x48] sm:$0xff] %vm313_vm1, %v236_v41  ;;  %322 = vst.msk [vmem:[%s492_s15 + $0x40] sm:$0xff] %vm313_vm1, %v234_v42 }
  0x99   : > { %356 = vst.msk [vmem:[%s492_s15 + $0x48] sm:$0xff] %vm346_vm2, %v465_v34  ;;  %355 = vst.msk [vmem:[%s492_s15 + $0x40] sm:$0xff] %vm346_vm2, %v465_v34 }
  0x9b   : > { %v240_v43 = vpop.permute.xlu1 %239  ;;  %v238_v44 = vpop.permute.xlu0 %237 }
  0x9c   : > { %325 = vst.msk [vmem:[%s492_s15 + $0x58] sm:$0xff] %vm313_vm1, %v240_v43  ;;  %324 = vst.msk [vmem:[%s492_s15 + $0x50] sm:$0xff] %vm313_vm1, %v238_v44 }
  0x9d   : > { %358 = vst.msk [vmem:[%s492_s15 + $0x58] sm:$0xff] %vm346_vm2, %v465_v34  ;;  %357 = vst.msk [vmem:[%s492_s15 + $0x50] sm:$0xff] %vm346_vm2, %v465_v34 }
  0x9f   : > { %v244_v45 = vpop.permute.xlu1 %243  ;;  %v242_v46 = vpop.permute.xlu0 %241 }
  0xa0   : > { %327 = vst.msk [vmem:[%s492_s15 + $0x68] sm:$0xff] %vm313_vm1, %v244_v45  ;;  %326 = vst.msk [vmem:[%s492_s15 + $0x60] sm:$0xff] %vm313_vm1, %v242_v46 }
  0xa1   : > { %360 = vst.msk [vmem:[%s492_s15 + $0x68] sm:$0xff] %vm346_vm2, %v465_v34  ;;  %359 = vst.msk [vmem:[%s492_s15 + $0x60] sm:$0xff] %vm346_vm2, %v465_v34 }
  0xa3   : > { %v248_v47 = vpop.permute.xlu1 %247  ;;  %v246_v48 = vpop.permute.xlu0 %245 }
  0xa4   : > { %329 = vst.msk [vmem:[%s492_s15 + $0x78] sm:$0xff] %vm313_vm1, %v248_v47  ;;  %328 = vst.msk [vmem:[%s492_s15 + $0x70] sm:$0xff] %vm313_vm1, %v246_v48 }
  0xa5   : > { %362 = vst.msk [vmem:[%s492_s15 + $0x78] sm:$0xff] %vm346_vm2, %v465_v34  ;;  %361 = vst.msk [vmem:[%s492_s15 + $0x70] sm:$0xff] %vm346_vm2, %v465_v34 }
  0xa7   : > { %v252_v49 = vpop.permute.xlu1 %251  ;;  %v250_v50 = vpop.permute.xlu0 %249 }
  0xa8   : > { %331 = vst.msk [vmem:[%s492_s15 + $0x88] sm:$0xff] %vm313_vm1, %v252_v49  ;;  %330 = vst.msk [vmem:[%s492_s15 + $0x80] sm:$0xff] %vm313_vm1, %v250_v50 }
  0xa9   : > { %364 = vst.msk [vmem:[%s492_s15 + $0x88] sm:$0xff] %vm346_vm2, %v465_v34  ;;  %363 = vst.msk [vmem:[%s492_s15 + $0x80] sm:$0xff] %vm346_vm2, %v465_v34 }
  0xab   : > { %v256_v51 = vpop.permute.xlu1 %255  ;;  %v254_v52 = vpop.permute.xlu0 %253 }
  0xac   : > { %333 = vst.msk [vmem:[%s492_s15 + $0x98] sm:$0xff] %vm313_vm1, %v256_v51  ;;  %332 = vst.msk [vmem:[%s492_s15 + $0x90] sm:$0xff] %vm313_vm1, %v254_v52 }
  0xad   : > { %366 = vst.msk [vmem:[%s492_s15 + $0x98] sm:$0xff] %vm346_vm2, %v465_v34  ;;  %365 = vst.msk [vmem:[%s492_s15 + $0x90] sm:$0xff] %vm346_vm2, %v465_v34 }
  0xaf   : > { %v260_v53 = vpop.permute.xlu1 %259  ;;  %v258_v54 = vpop.permute.xlu0 %257 }
  0xb0   : > { %335 = vst.msk [vmem:[%s492_s15 + $0xa8] sm:$0xff] %vm313_vm1, %v260_v53  ;;  %334 = vst.msk [vmem:[%s492_s15 + $0xa0] sm:$0xff] %vm313_vm1, %v258_v54 }
  0xb1   : > { %368 = vst.msk [vmem:[%s492_s15 + $0xa8] sm:$0xff] %vm346_vm2, %v465_v34  ;;  %367 = vst.msk [vmem:[%s492_s15 + $0xa0] sm:$0xff] %vm346_vm2, %v465_v34 }
  0xb3   : > { %v264_v55 = vpop.permute.xlu1 %263  ;;  %v262_v56 = vpop.permute.xlu0 %261 }
  0xb4   : > { %337 = vst.msk [vmem:[%s492_s15 + $0xb8] sm:$0xff] %vm313_vm1, %v264_v55  ;;  %336 = vst.msk [vmem:[%s492_s15 + $0xb0] sm:$0xff] %vm313_vm1, %v262_v56 }
  0xb5   : > { %370 = vst.msk [vmem:[%s492_s15 + $0xb8] sm:$0xff] %vm346_vm2, %v465_v34  ;;  %369 = vst.msk [vmem:[%s492_s15 + $0xb0] sm:$0xff] %vm346_vm2, %v465_v34 }
  0xb7   : > { %v268_v57 = vpop.permute.xlu1 %267  ;;  %v266_v58 = vpop.permute.xlu0 %265 }
  0xb8   : > { %339 = vst.msk [vmem:[%s492_s15 + $0xc8] sm:$0xff] %vm313_vm1, %v268_v57  ;;  %338 = vst.msk [vmem:[%s492_s15 + $0xc0] sm:$0xff] %vm313_vm1, %v266_v58 }
  0xb9   : > { %372 = vst.msk [vmem:[%s492_s15 + $0xc8] sm:$0xff] %vm346_vm2, %v465_v34  ;;  %371 = vst.msk [vmem:[%s492_s15 + $0xc0] sm:$0xff] %vm346_vm2, %v465_v34 }
  0xbb   : > { %v272_v59 = vpop.permute.xlu1 %271  ;;  %v270_v60 = vpop.permute.xlu0 %269 }
  0xbc   : > { %341 = vst.msk [vmem:[%s492_s15 + $0xd8] sm:$0xff] %vm313_vm1, %v272_v59  ;;  %340 = vst.msk [vmem:[%s492_s15 + $0xd0] sm:$0xff] %vm313_vm1, %v270_v60 }
  0xbd   : > { %374 = vst.msk [vmem:[%s492_s15 + $0xd8] sm:$0xff] %vm346_vm2, %v465_v34  ;;  %373 = vst.msk [vmem:[%s492_s15 + $0xd0] sm:$0xff] %vm346_vm2, %v465_v34 }
  0xbf   : > { %v276_v61 = vpop.permute.xlu1 %275  ;;  %v274_v62 = vpop.permute.xlu0 %273 }
  0xc0   : > { %343 = vst.msk [vmem:[%s492_s15 + $0xe8] sm:$0xff] %vm313_vm1, %v276_v61  ;;  %342 = vst.msk [vmem:[%s492_s15 + $0xe0] sm:$0xff] %vm313_vm1, %v274_v62 }
  0xc1   : > { %376 = vst.msk [vmem:[%s492_s15 + $0xe8] sm:$0xff] %vm346_vm2, %v465_v34  ;;  %375 = vst.msk [vmem:[%s492_s15 + $0xe0] sm:$0xff] %vm346_vm2, %v465_v34 }
  0xc3   : > { %v280_v63 = vpop.permute.xlu1 %279  ;;  %v278_v0 = vpop.permute.xlu0 %277 }
  0xc4   : > { %345 = vst.msk [vmem:[%s492_s15 + $0xf8] sm:$0xff] %vm313_vm1, %v280_v63  ;;  %344 = vst.msk [vmem:[%s492_s15 + $0xf0] sm:$0xff] %vm313_vm1, %v278_v0 }
  0xc5   : > { %378 = vst.msk [vmem:[%s492_s15 + $0xf8] sm:$0xff] %vm346_vm2, %v465_v34  ;;  %377 = vst.msk [vmem:[%s492_s15 + $0xf0] sm:$0xff] %vm346_vm2, %v465_v34 }
  0xc6 PF: > { %s11_s6 = sadd.s32 1, %s462_s6  }
  0xc7   : > { %p8_p4 = scmp.ge.s32.totalorder %s11_s6, 6  }
  0xc9   :  { %10 = sbr.rel (!%p8_p4) target bundleno = 1 (0x1), region = 54 }

</bundles_post_ra>
